<compile_context>
chip_gen: v5e
topology: v5e:2x2
jax: 0.10.0
libtpu: 0.0.40
codegen_flags: <defaults>
</compile_context>

<pallas_src>
import functools
import math

import jax
import jax.numpy as jnp
from jax import lax
from jax.experimental import pallas as pl
from jax.experimental.pallas import tpu as pltpu

FLOAT_MIN = float(jnp.finfo(jnp.float32).min)


def _attn_kernel(q_ref, k_ref, v_ref, *rest, scale, mask_mode, binary_mask):
    """One (batch, key-tile) grid step.

    q_ref:   (Lq, D)   resident across the key-tile axis
    k_ref:   (TK, D)
    v_ref:   (TK, Dv)
    m_ref:   (Lq, 1) for mask_mode=="vec", (Lq, TK) for mask_mode=="full"
    o_ref:   (Lq, Dv)  resident across the key-tile axis (written on last step)
    acc_ref: (Lq, Dv)  float32 VMEM accumulator
    """
    if mask_mode == "none":
        o_ref, acc_ref = rest
        m_ref = None
    else:
        m_ref, o_ref, acc_ref = rest

    ks = pl.program_id(1)

    @pl.when(ks == 0)
    def _():
        acc_ref[...] = jnp.zeros_like(acc_ref)

    # scores = (Q @ K^T) / sqrt(k_dim)  -> (Lq, TK).  dot_general contracts the
    # shared last dim directly (no explicit K transpose); MXU accumulates in f32
    # even for bf16 operands.
    s = lax.dot_general(
        q_ref[...],
        k_ref[...],
        dimension_numbers=(((1,), (1,)), ((), ())),
        preferred_element_type=jnp.float32,
    ) * scale

    if m_ref is not None:
        m = m_ref[...]
        if binary_mask:
            # Exact for {0,1} masks; the select runs on the VPU, keeping the EUP
            # free for the softmax exp.
            inf_mask = jnp.where(m != 0, jnp.float32(0.0), jnp.float32(FLOAT_MIN))
        else:
            # General-valued masks: faithful log + clamp (log(0) -> FLOAT_MIN).
            inf_mask = jnp.maximum(jnp.log(m.astype(jnp.float32)), FLOAT_MIN)
        s = s + inf_mask  # (Lq, 1) or (Lq, TK): broadcasts over the key tile

    # Softmax over the *query* axis (axis 0 here == dim=1 of [B, Lq, Lk]).
    # Each key column is an independent softmax -> no cross-tile state needed.
    col_max = jnp.max(s, axis=0, keepdims=True)     # (1, TK)
    p = jnp.exp(s - col_max)                        # (Lq, TK)
    denom = jnp.sum(p, axis=0, keepdims=True)       # (1, TK)
    # Reciprocal over only TK values; exact divide keeps numerics tight and its
    # EUP cost at this size is negligible.
    inv = pl.reciprocal(denom, approx=False)        # (1, TK)

    # Normalize by scaling the V rows (TK*Dv multiplies) instead of the whole
    # (Lq, TK) probability matrix; feed the second matmul in the value dtype
    # so bf16 inputs stay on the fast MXU path.
    v = v_ref[...]
    v_scaled = (v.astype(jnp.float32) * inv.reshape(-1, 1)).astype(v.dtype)
    acc_ref[...] += jnp.dot(
        p.astype(v.dtype), v_scaled, preferred_element_type=jnp.float32
    )

    @pl.when(ks == pl.num_programs(1) - 1)
    def _():
        o_ref[...] = acc_ref[...].astype(o_ref.dtype)


def _pick_key_tile(Lk):
    # Prefer MXU-friendly tile sizes (multiples of 128/256); fall back to the
    # whole axis for small or ragged Lk.
    for tk in (512, 256, 128):
        if Lk % tk == 0:
            return tk
    # TODO(synk): pad ragged Lk up to a multiple of 128 instead of taking the full axis.
    return Lk


def dot_product_attention(query, key, value, mask=None, *, k_dim=None):
    """Pallas equivalent of DotProductAttention.forward."""
    B, Lq, D = query.shape
    Bk, Lk, Dk = key.shape
    Bv, Lkv, Dv = value.shape
    assert Dk == D and Bk == B and Bv == B and Lkv == Lk
    if k_dim is None:
        k_dim = D
    scale = 1.0 / math.sqrt(float(k_dim))

    tk = _pick_key_tile(Lk)
    nk = Lk // tk

    in_specs = [
        pl.BlockSpec((None, Lq, D), lambda b, ks: (b, 0, 0)),
        pl.BlockSpec((None, tk, D), lambda b, ks: (b, ks, 0)),
        pl.BlockSpec((None, tk, Dv), lambda b, ks: (b, ks, 0)),
    ]
    inputs = [query, key, value]

    if mask is None:
        mask_mode = "none"
        binary_mask = False
        mask_itemsize = 0
        mask_tile_elems = 0
    else:
        binary_mask = bool(
            jnp.issubdtype(mask.dtype, jnp.bool_) or jnp.issubdtype(mask.dtype, jnp.integer)
        )
        if binary_mask:
            # TODO(synk): keep boolean/integer masks in a narrower dtype than f32
            # for the 3-D case; for the [B, Lq, 1] case this is tiny anyway.
            mask = mask.astype(jnp.float32)
        if mask.ndim == 2:
            # PyTorch path: mask.unsqueeze(-1).expand(-1, -1, Lk).  Keep it
            # narrow ([B, Lq, 1]) and broadcast inside the kernel instead of
            # streaming a dense [B, Lq, Lk] tensor from HBM.
            assert mask.shape == (B, Lq)
            mask_mode = "vec"
            mask = mask.reshape(B, Lq, 1)
            in_specs.append(pl.BlockSpec((None, Lq, 1), lambda b, ks: (b, 0, 0)))
            mask_tile_elems = Lq
        else:
            assert mask.shape == (B, Lq, Lk)
            mask_mode = "full"
            in_specs.append(pl.BlockSpec((None, Lq, tk), lambda b, ks: (b, 0, ks)))
            mask_tile_elems = Lq * tk
        mask_itemsize = jnp.dtype(mask.dtype).itemsize
        inputs.append(mask)

    out_dtype = value.dtype

    # Rough per-step VMEM estimate (double-buffered inputs/outputs + scratch +
    # score temporaries); clamp to the v7x physical limit of 64 MiB.
    in_itemsize = jnp.dtype(query.dtype).itemsize
    est = (
        2 * Lq * D * in_itemsize            # Q block
        + 2 * tk * (D + Dv) * in_itemsize   # K, V tiles
        + 2 * Lq * Dv * jnp.dtype(out_dtype).itemsize  # output block
        + Lq * Dv * 4                       # accumulator scratch
        + 3 * Lq * tk * 4                   # scores / exp temporaries
        + 2 * mask_tile_elems * mask_itemsize
    )
    vmem_limit = int(min(max(est * 2, 32 * 1024 * 1024), 64 * 1024 * 1024))

    kernel = functools.partial(
        _attn_kernel, scale=scale, mask_mode=mask_mode, binary_mask=binary_mask
    )

    return pl.pallas_call(
        kernel,
        out_shape=jax.ShapeDtypeStruct((B, Lq, Dv), out_dtype),
        grid_spec=pltpu.PrefetchScalarGridSpec(
            num_scalar_prefetch=0,
            grid=(B, nk),
            in_specs=in_specs,
            out_specs=pl.BlockSpec((None, Lq, Dv), lambda b, ks: (b, 0, 0)),
            scratch_shapes=[pltpu.VMEM((Lq, Dv), jnp.float32)],
        ),
        compiler_params=pltpu.CompilerParams(
            dimension_semantics=("parallel", "arbitrary"),
            vmem_limit_bytes=vmem_limit,
        ),
    )(*inputs)


def _reference(query, key, value, mask, k_dim):
    # Pure-JAX reference mirroring the PyTorch module.
    mul = jnp.einsum(
        "bqd,bkd->bqk", query.astype(jnp.float32), key.astype(jnp.float32)
    ) / jnp.sqrt(jnp.float32(k_dim))
    if mask is not None:
        if mask.ndim != mul.ndim:
            mask = jnp.broadcast_to(mask[..., None], mul.shape)
        inf_mask = jnp.maximum(jnp.log(mask.astype(jnp.float32)), FLOAT_MIN)
        mul = mul + inf_mask
    mul = jax.nn.softmax(mul, axis=1)
    return jnp.einsum("bqk,bkv->bqv", mul, value.astype(jnp.float32))


if __name__ == "__main__":
    B, Lq, Lk, D, Dv = 2, 8, 8, 32, 32
    k_dim = D

    root = jax.random.PRNGKey(0)
    kq, kk, kv, km = jax.random.split(root, 4)
    query = jax.random.normal(kq, (B, Lq, D), dtype=jnp.float32)
    key_t = jax.random.normal(kk, (B, Lk, D), dtype=jnp.float32)
    value = jax.random.normal(kv, (B, Lk, Dv), dtype=jnp.float32)

    # 1) 2-D 0/1 float mask -> exercises the unsqueeze/expand semantics with a
    #    narrow [B, Lq, 1] mask stream and the log+clamp path.
    mask2d = (jax.random.uniform(km, (B, Lq)) > 0.2).astype(jnp.float32)
    out = jax.block_until_ready(
        dot_product_attention(query, key_t, value, mask2d, k_dim=k_dim)
    )
    ref = _reference(query, key_t, value, mask2d, k_dim)
    assert out.shape == (B, Lq, Dv)
    assert jnp.allclose(out, ref, atol=1e-5, rtol=1e-5), "mismatch (2-D mask)"

    # 2) mask=None -> mask-free kernel variant (no mask DMA at all).
    out_nm = jax.block_until_ready(
        dot_product_attention(query, key_t, value, None, k_dim=k_dim)
    )
    ref_nm = _reference(query, key_t, value, None, k_dim)
    assert jnp.allclose(out_nm, ref_nm, atol=1e-5, rtol=1e-5), "mismatch (no mask)"

    # 3) 3-D boolean mask -> key-tiled mask blocks + VPU select (no log).
    mask3d = jax.random.uniform(jax.random.fold_in(km, 1), (B, Lq, Lk)) > 0.3
    out_3d = jax.block_until_ready(
        dot_product_attention(query, key_t, value, mask3d, k_dim=k_dim)
    )
    ref_3d = _reference(query, key_t, value, mask3d.astype(jnp.float32), k_dim)
    assert jnp.allclose(out_3d, ref_3d, atol=1e-5, rtol=1e-5), "mismatch (3-D mask)"

    print("KERNEL_OK")
</pallas_src>

<mosaic_0001>
module attributes {stable_mosaic.version = 11 : i64} {
  func.func @_attn_kernel(%arg0: i32, %arg1: i32, %arg2: memref<1x8x32xf32, #tpu.memory_space<vmem>>, %arg3: memref<1x8x32xf32, #tpu.memory_space<vmem>>, %arg4: memref<1x8x32xf32, #tpu.memory_space<vmem>>, %arg5: memref<1x8x1xf32, #tpu.memory_space<vmem>>, %arg6: memref<1x8x32xf32, #tpu.memory_space<vmem>>, %arg7: memref<8x32xf32, #tpu.memory_space<vmem>>) attributes {dimension_semantics = [#tpu.dimension_semantics<parallel>, #tpu.dimension_semantics<arbitrary>], iteration_bounds = array<i64: 2, 1>, scalar_prefetch = 0 : i64, scratch_operands = 1 : i64, tpu.core_type = #tpu.core_type<tc>, window_params = [{transform_indices = @transform_0, window_bounds = array<i64: 1, 8, 32>}, {transform_indices = @transform_1, window_bounds = array<i64: 1, 8, 32>}, {transform_indices = @transform_2, window_bounds = array<i64: 1, 8, 32>}, {transform_indices = @transform_3, window_bounds = array<i64: 1, 8, 1>}, {transform_indices = @transform_4, window_bounds = array<i64: 1, 8, 32>}]} {
    %c0_i32 = arith.constant 0 : i32
    %0 = arith.cmpi eq, %arg1, %c0_i32 : i32
    %1 = arith.extui %0 : i1 to i32
    %c0_i32_0 = arith.constant 0 : i32
    %2 = arith.cmpi ne, %1, %c0_i32_0 : i32
    scf.if %2 {
      %cst_23 = arith.constant 0.000000e+00 : f32
      %37 = vector.broadcast %cst_23 : f32 to vector<8x32xf32>
      %c0_24 = arith.constant 0 : index
      %c0_25 = arith.constant 0 : index
      %38 = vector.load %arg7[%c0_24, %c0_25] : memref<8x32xf32, #tpu.memory_space<vmem>>, vector<8x32xf32>
      tpu.vector_store %arg7[%c0_24, %c0_25], %37 {strides = array<i32>} : memref<8x32xf32, #tpu.memory_space<vmem>>, vector<8x32xf32>,
    } else {
    }
    %c0 = arith.constant 0 : index
    %c0_1 = arith.constant 0 : index
    %c0_2 = arith.constant 0 : index
    %3 = vector.load %arg2[%c0, %c0_1, %c0_2] : memref<1x8x32xf32, #tpu.memory_space<vmem>>, vector<1x8x32xf32>
    %4 = vector.shape_cast %3 : vector<1x8x32xf32> to vector<8x32xf32>
    %c0_3 = arith.constant 0 : index
    %c0_4 = arith.constant 0 : index
    %c0_5 = arith.constant 0 : index
    %5 = vector.load %arg3[%c0_3, %c0_4, %c0_5] : memref<1x8x32xf32, #tpu.memory_space<vmem>>, vector<1x8x32xf32>
    %6 = vector.shape_cast %5 : vector<1x8x32xf32> to vector<8x32xf32>
    %cst = arith.constant dense<0.000000e+00> : vector<8x8xf32>
    %7 = tpu.matmul %4, %6, %cst {dimension_numbers = #tpu.dot_dimension_numbers<[1], [1], [0], [0], [0, 0, 1, 0], [], []>} : vector<8x32xf32>, vector<8x32xf32>, vector<8x8xf32> -> vector<8x8xf32>
    %cst_6 = arith.constant 0.176776692 : f32
    %8 = vector.broadcast %cst_6 : f32 to vector<8x8xf32>
    %9 = arith.mulf %7, %8 : vector<8x8xf32>
    %c0_7 = arith.constant 0 : index
    %c0_8 = arith.constant 0 : index
    %c0_9 = arith.constant 0 : index
    %10 = vector.load %arg5[%c0_7, %c0_8, %c0_9] : memref<1x8x1xf32, #tpu.memory_space<vmem>>, vector<1x8x1xf32>
    %11 = vector.shape_cast %10 : vector<1x8x1xf32> to vector<8x1xf32>
    %12 = math.log %11 : vector<8x1xf32>
    %cst_10 = arith.constant -3.40282347E+38 : f32
    %13 = vector.broadcast %cst_10 : f32 to vector<8x1xf32>
    %14 = arith.maximumf %12, %13 : vector<8x1xf32>
    %15 = vector.broadcast %14 : vector<8x1xf32> to vector<8x8xf32>
    %16 = arith.addf %9, %15 : vector<8x8xf32>
    %cst_11 = arith.constant dense<0xFF800000> : vector<8xf32>
    %17 = vector.multi_reduction <maximumf>, %16, %cst_11 [0] : vector<8x8xf32> to vector<8xf32>
    %18 = vector.shape_cast %17 : vector<8xf32> to vector<1x8xf32>
    %19 = vector.broadcast %18 : vector<1x8xf32> to vector<8x8xf32>
    %20 = arith.subf %16, %19 : vector<8x8xf32>
    %21 = math.exp %20 : vector<8x8xf32>
    %cst_12 = arith.constant dense<0.000000e+00> : vector<8xf32>
    %22 = vector.multi_reduction <add>, %21, %cst_12 [0] : vector<8x8xf32> to vector<8xf32>
    %23 = vector.shape_cast %22 : vector<8xf32> to vector<1x8xf32>
    %24 = tpu.reciprocal %23 : vector<1x8xf32> -> vector<1x8xf32>
    %c0_13 = arith.constant 0 : index
    %c0_14 = arith.constant 0 : index
    %c0_15 = arith.constant 0 : index
    %25 = vector.load %arg4[%c0_13, %c0_14, %c0_15] : memref<1x8x32xf32, #tpu.memory_space<vmem>>, vector<1x8x32xf32>
    %26 = vector.shape_cast %25 : vector<1x8x32xf32> to vector<8x32xf32>
    %27 = vector.shape_cast %24 : vector<1x8xf32> to vector<8x1xf32>
    %28 = vector.broadcast %27 : vector<8x1xf32> to vector<8x32xf32>
    %29 = arith.mulf %26, %28 : vector<8x32xf32>
    %c0_16 = arith.constant 0 : index
    %c0_17 = arith.constant 0 : index
    %30 = vector.load %arg7[%c0_16, %c0_17] : memref<8x32xf32, #tpu.memory_space<vmem>>, vector<8x32xf32>
    %cst_18 = arith.constant dense<0.000000e+00> : vector<8x32xf32>
    %31 = tpu.matmul %21, %29, %cst_18 {dimension_numbers = #tpu.dot_dimension_numbers<[1], [0], [0], [1], [0, 0, 1, 1], [], []>} : vector<8x8xf32>, vector<8x32xf32>, vector<8x32xf32> -> vector<8x32xf32>
    %32 = arith.addf %30, %31 : vector<8x32xf32>
    %c0_19 = arith.constant 0 : index
    %c0_20 = arith.constant 0 : index
    %33 = vector.load %arg7[%c0_19, %c0_20] : memref<8x32xf32, #tpu.memory_space<vmem>>, vector<8x32xf32>
    tpu.vector_store %arg7[%c0_19, %c0_20], %32 {strides = array<i32>} : memref<8x32xf32, #tpu.memory_space<vmem>>, vector<8x32xf32>,
    %c0_i32_21 = arith.constant 0 : i32
    %34 = arith.cmpi eq, %arg1, %c0_i32_21 : i32
    %35 = arith.extui %34 : i1 to i32
    %c0_i32_22 = arith.constant 0 : i32
    %36 = arith.cmpi ne, %35, %c0_i32_22 : i32
    scf.if %36 {
      %c0_23 = arith.constant 0 : index
      %c0_24 = arith.constant 0 : index
      %37 = vector.load %arg7[%c0_23, %c0_24] : memref<8x32xf32, #tpu.memory_space<vmem>>, vector<8x32xf32>
      %c0_25 = arith.constant 0 : index
      %c0_26 = arith.constant 0 : index
      %c0_27 = arith.constant 0 : index
      %38 = vector.load %arg6[%c0_25, %c0_26, %c0_27] : memref<1x8x32xf32, #tpu.memory_space<vmem>>, vector<1x8x32xf32>
      %39 = vector.shape_cast %38 : vector<1x8x32xf32> to vector<8x32xf32>
      %40 = vector.shape_cast %37 : vector<8x32xf32> to vector<1x8x32xf32>
      tpu.vector_store %arg6[%c0_25, %c0_26, %c0_27], %40 {strides = array<i32>} : memref<1x8x32xf32, #tpu.memory_space<vmem>>, vector<1x8x32xf32>,
    } else {
    }
    return
  }
  func.func @transform_0(%arg0: i32, %arg1: i32) -> (i32, i32, i32) {
    %c0_i32 = arith.constant 0 : i32
    %c0_i32_0 = arith.constant 0 : i32
    %c0_i32_1 = arith.constant 0 : i32
    return %arg0, %c0_i32, %c0_i32_0 : i32, i32, i32
  }
  func.func @transform_1(%arg0: i32, %arg1: i32) -> (i32, i32, i32) {
    %c0_i32 = arith.constant 0 : i32
    %c0_i32_0 = arith.constant 0 : i32
    return %arg0, %arg1, %c0_i32 : i32, i32, i32
  }
  func.func @transform_2(%arg0: i32, %arg1: i32) -> (i32, i32, i32) {
    %c0_i32 = arith.constant 0 : i32
    %c0_i32_0 = arith.constant 0 : i32
    return %arg0, %arg1, %c0_i32 : i32, i32, i32
  }
  func.func @transform_3(%arg0: i32, %arg1: i32) -> (i32, i32, i32) {
    %c0_i32 = arith.constant 0 : i32
    %c0_i32_0 = arith.constant 0 : i32
    %c0_i32_1 = arith.constant 0 : i32
    return %arg0, %c0_i32, %c0_i32_0 : i32, i32, i32
  }
  func.func @transform_4(%arg0: i32, %arg1: i32) -> (i32, i32, i32) {
    %c0_i32 = arith.constant 0 : i32
    %c0_i32_0 = arith.constant 0 : i32
    %c0_i32_1 = arith.constant 0 : i32
    return %arg0, %c0_i32, %c0_i32_0 : i32, i32, i32
  }
}

</mosaic_0001>

<bundles_post_ra>
// kernel: tpu_custom_call.1
= control target key start
LH: loop header
LB: loop body
LE: loop exit
PB: predicated region body
PF: predicated region fallthrough
CT: control target
= control target key end

     0   :  { %9 = vsyncpa [#allocation4], 0  ;;  %s990_s0 = inlined_call_operand.vmem [shape: f32[2,8,32], index: 0, kind: input, shape index: {}]   ;;  %s991_s1 = inlined_call_operand.hbm [shape: f32[2,8,32], index: 1, kind: input, shape index: {}]   ;;  %s992_s2 = inlined_call_operand.hbm [shape: f32[2,8,32], index: 2, kind: input, shape index: {}]   ;;  %s993_s3 = inlined_call_operand.vmem [shape: f32[2,8,1], index: 3, kind: input, shape index: {}]   ;;  %s994_s4 = inlined_call_operand.hbm [shape: f32[2,8,32], index: 4, kind: output, shape index: {}]  }
   0x1   :  { %11 = vsyncpa [#allocation4 + $0x1], 0 }
   0x2   :  { %12 = vsyncpa [#allocation7], 0 }
   0x3   :  { %14 = vsyncpa [#allocation7 + $0x1], 0 }
   0x4   :  { %15 = vsyncpa [#allocation5], 0 }
   0x5   :  { %17 = vsyncpa [#allocation5 + $0x1], 0  ;;  %s839_s15 = smov 0   ;;  %s841_s16 = smov 0  }
   0x6   :  { %s843_s17 = smov 0   ;;  %s845_s18 = smov 0  }
   0x7   :  { %s847_s19 = smov 0   ;;  %s849_s20 = smov 0  }
   0x8 LB: > { %s566_s21 = sadd.s32 4294967295, %s810_s20   ;;  %s567_s22 = sadd.s32 4294967294, %s810_s20   ;;  %s810_s20 = sphi %s849_s20, %s23_s20   ;;  %s806_s19 = sphi %s847_s19, %s1006_s19   ;;  %s802_s18 = sphi %s845_s18, %s1005_s18   ;;  %s798_s17 = sphi %s843_s17, %s1004_s17   ;;  %s794_s16 = sphi %s841_s16, %s1003_s16   ;;  %s790_s15 = sphi %s839_s15, %s1002_s15  }
   0x9   : > { %s35_s23 = sadd.s32 1, %s806_s19  ;;  %s70_s24 = sadd.s32 1, %s798_s17 }
   0xa   : > { %p37_p0 = scmp.ge.s32.totalorder %s35_s23, 2  ;;  %p77_p1 = scmp.ne.s32.totalorder %s798_s17, %s794_s16 }
   0xb   : > { %p78_p2 = scmp.eq.s32.totalorder %s810_s20, 0  ;;  %p83_p3 = scmp.ne.s32.totalorder %s794_s16, %s790_s15 }
   0xc   : > { %s1008_s23 = smov (%p37_p0, %s35_s23), 0  ;;  %p84_p5 = scmp.eq.s32.totalorder %s566_s21, 0 }
   0xd   : > { %996 = sst [smem:[#allocation12_spill]] %s1008_s23  ;;  %p880_p4 = por %p78_p2, %p77_p1 }
   0xe   : > { %s65_s26 = ssub.s32 %s806_s19, %s1008_s23  ;;  %p161_p6 = scmp.eq.s32.totalorder %s566_s21, 1 }
   0xf   : > { %p68_p7 = scmp.eq.s32.totalorder %s65_s26, 0  ;;  %p886_p8 = por %p84_p5, %p83_p3 }
  0x10   : > { %p890_p9 = por %p161_p6, %p77_p1  ;;  %p167_p10 = scmp.eq.s32.totalorder %s567_s22, 1 }
  0x11   : > { %s895_s29 = scalar_select %p68_p7, %s798_s17, %s70_s24  }
  0x12   : > { %p897_p11 = por %p167_p10, %p83_p3  ;;  %p569_p12 = scmp.ge.s32.totalorder %s810_s20, 2 }
  0x13   : > { %p604_p13 = scmp.lt.s32.totalorder %s810_s20, 2  ;;  %s194_s5 = sand.u32 1, %s798_s17  }
  0x14   : > { %s570_s6 = sshll.u32 %s194_s5, 3  ;;  %s571_s7 = sshll.u32 %s806_s19, 3 }
  0x15   : > { %s203_s10 = scalar_lea.hbm %s991_s1, %s571_s7  ;;  %s198_s11 = scalar_lea.vmem [#allocation3], %s570_s6 }
  0x16   : > { %s207_s12 = sshll.u32 %s198_s11, 4  ;;  %s205_s13 = sshll.u32 %s203_s10, 4  ;;  %s208_s12 = int_to_ptr.vmem [resolvable:$true] %s207_s12  ;;  %s206_s13 = int_to_ptr.hbm [resolvable:$true] %s205_s13 }
  0x17   : > { %p594_p0 = pnand %p604_p13, %p880_p4  ;;  %p574_p1 = scmp.ge.s32.totalorder %s810_s20, 1 }
  0x18   : > { %p239_p2 = scmp.lt.s32.totalorder %s810_s20, 3  ;;  %s195_s14 = scalar_lea.sflag [#allocation4], %s194_s5 }
  0x19   : > { %596 = dma.hbm_to_vmem [thread:$0]  (!%p594_p0), %s206_s13, 128, %s208_s12, %s195_s14  }
  0x1a   : > { %p240_p3 = pnand %p574_p1, %p239_p2  ;;  %s223_s24 = scalar_lea.hbm %s992_s2, %s571_s7 }
  0x1b   : > { %s218_s26 = scalar_lea.vmem [#allocation6], %s570_s6  ;;  %s225_s8 = sshll.u32 %s223_s24, 4  ;;  %s226_s8 = int_to_ptr.hbm [resolvable:$true] %s225_s8 }
  0x1c   : > { %s227_s23 = sshll.u32 %s218_s26, 4  ;;  %s215_s9 = scalar_lea.sflag [#allocation7], %s194_s5  ;;  %s228_s23 = int_to_ptr.vmem [resolvable:$true] %s227_s23 }
  0x1d   : > { %599 = dma.hbm_to_vmem [thread:$0]  (!%p594_p0), %s226_s8, 128, %s228_s23, %s215_s9  }
  0x1e   : > { %243 = sbr.rel (%p240_p3) target bundleno = 487 (0x1e7), region = 36  ;;  %s916_s25 = sand.u32 (!%p240_p3), 1, %s794_s16  }
  0x1f   : > { %s919_s10 = sshll.u32 (!%p240_p3), %s916_s25, 3  ;;  %s246_s11 = scalar_lea.sflag (!%p240_p3), [#allocation4], %s916_s25 }
  0x20   : > { %s249_s12 = scalar_lea.vmem (!%p240_p3), [#allocation3], %s919_s10 }
  0x23   : > { %777 = dma.done.wait (%p886_p8), %s246_s11, 128  }
  0x24   : > { %779 = vsyncadd (%p886_p8), %s246_s11, 4294967168  ;;  %s256_s23 = scalar_lea.sflag [#allocation7], %s916_s25  ;;  %s259_s5 = scalar_lea.vmem [#allocation6], %s919_s10 }
  0x25   : > { %781 = dma.done.wait (%p886_p8), %s256_s23, 128  }
  0x26   : > { %783 = vsyncadd (%p886_p8), %s256_s23, 4294967168  ;;  %vm310_vm0 = vcmask 261120   ;;  %p298_p4 = scmp.lt.s32.totalorder %s802_s18, 1  ;;  %v812_v0 = vmov 0.0   ;;  %v813_v1 = vmov 0   ;;  %v313_v2 = vld [vmem:[%s249_s12] sm:$0xff]  ;;  %v385_v16 = vlaneseq }
  0x27   : > { %311 = vst.msk [vmem:[#allocation2] sm:$0xff] %vm310_vm0, %v812_v0  ;;  %656 = vset.pattern.permute.xlu0 %v813_v1  ;;  %580 = vmatpush.xpose.msk.msra.mxu0 %vm310_vm0, %v313_v2  ;;  %vm352_vm1 = vcmask 64512   ;;  %v384_v41 = vld [vmem:[%s259_s5] sm:$0xff]  ;;  %s584_s26 = sshll.u32 %s802_s18, 3  ;;  %s297_s12 = scalar_lea.vmem [#allocation8], %s919_s10 }
  0x28   : > { %s299_s6 = scalar_select %p298_p4, %s802_s18, 1  ;;  %v386_v18 = vshrl.u32 %v385_v16, 7 }
  0x29   : > { %s434_s11 = scalar_lea.hbm %s994_s4, %s584_s26  ;;  %s436_s23 = sshll.u32 %s297_s12, 4  ;;  %s437_s23 = int_to_ptr.vmem [resolvable:$true] %s436_s23 }
  0x2a   : > { %s578_s7 = sshll.u32 %s299_s6, 3  ;;  %s438_s5 = sshll.u32 %s434_s11, 4  ;;  %s439_s5 = int_to_ptr.hbm [resolvable:$true] %s438_s5 }
  0x2b   : > { %s301_s21 = scalar_lea.vmem %s990_s0, %s578_s7  ;;  %s305_s27 = scalar_lea.vmem %s993_s3, %s578_s7 }
  0x2c   : > { %v342_v3 = vld [vmem:[%s305_s27] sm:$0xff]  ;;  %s424_s6 = scalar_lea.sflag [#allocation5], %s916_s25  ;;  %s738_s7 = sshra.s32 %s439_s5, 4  ;;  %s739_s7 = int_to_ptr.hbm [resolvable:$true] %s738_s7 }
  0x2d   : > { %v312_v4 = vld [vmem:[%s301_s21] sm:$0xff]  ;;  %658 = vlog2.f32 %v342_v3  ;;  %s740_s18 = scalar_lea.hbm %s739_s7, 8  ;;  %s744_s21 = scalar_lea.hbm %s994_s4, 16 }
  0x2e   : > { %581 = vmatmul.msk.f32.vlgmr.msra.gmra.mxu0 %vm310_vm0, %v312_v4  ;;  %v392_v44 = vld [vmem:[#allocation2] sm:$0xff]  ;;  %p741_p5 = scmp.ne.s32.totalorder %s739_s7, %s740_s18  ;;  %p745_p8 = scmp.lt.s32.totalorder %s739_s7, %s994_s4 }
  0x2f   : > { %p746_p10 = scmp.lt.s32.totalorder %s744_s21, %s740_s18 }
  0x30   : > { %p742_p6 = pnand %p741_p5, %p890_p9 }
  0x31   : > { %p747_p13 = por %p746_p10, %p745_p8 }
  0x32   : > { %p743_p7 = pneg %p742_p6 }
  0x33   : > { %v659_v5 = vpop.eup %658 }
  0x34   : > { %v344_v6 = vmul.f32 0.6931472, %v659_v5  ;;  %p748_p0 = pnand %p747_p13, %p743_p7 }
  0x36   : > { %v345_v7 = vmax.f32 %v344_v6, -3.4028235e+38 }
  0x38   : > { %348 = vperm.xlu0 %656, %v345_v7  }
  0x40   : > { %657 = vset.pattern.permute.xlu0 %v386_v18 }
  0xaa   : > { %v349_v9 = vpop.permute.xlu0 %348 }
  0xab   : > { %v338_v8 = vpop.f32.mrf.mxu0 }
  0xac   : > { %v341_v10 = vmul.f32 0.17677669, %v338_v8 }
  0xae   : > { %v351_v11 = vadd.f32 %v349_v9, %v341_v10 }
  0xb0   : > { %v353_v12 = vsel %vm352_vm1, %v351_v11, -inf }
  0xb1   : > { %v354_v13 = vrot.slane %v353_v12, 4 }
  0xb3   : > { %v355_v14 = vmax.f32 %v353_v12, %v354_v13 }
  0xb5   : > { %v356_v15 = vrot.slane %v355_v14, 2 }
  0xb7   : > { %v357_v17 = vmax.f32 %v355_v14, %v356_v15 }
  0xb9   : > { %v358_v19 = vrot.slane %v357_v17, 1 }
  0xbb   : > { %v359_v20 = vmax.f32 %v357_v17, %v358_v19 }
  0xbd   : > { %v360_v21 = vsub.f32 %v351_v11, %v359_v20 }
  0xbf   : > { %v361_v22 = vmul.f32 1.442695, %v360_v21 }
  0xc1   : > { %660 = vpow2.f32 %v361_v22 }
  0xc7   : > { %v661_v23 = vpop.eup %660 }
  0xc8   : > { %v363_v24 = vsel %vm352_vm1, %v661_v23, 0.0 }
  0xc9   : > { %v364_v25 = vrot.slane %v363_v24, 4 }
  0xcb   : > { %v365_v26 = vadd.f32 %v364_v25, %v363_v24 }
  0xcd   : > { %v366_v27 = vrot.slane %v365_v26, 2 }
  0xcf   : > { %v367_v28 = vadd.f32 %v366_v27, %v365_v26 }
  0xd1   : > { %v368_v29 = vrot.slane %v367_v28, 1 }
  0xd3   : > { %v369_v30 = vadd.f32 %v368_v29, %v367_v28 }
  0xd5   : > { %662 = vrcp.f32 %v369_v30  ;;  %v381_v34 = vand.u32 2147483648, %v369_v30  ;;  %v379_v36 = vand.u32 2147483647, %v369_v30  ;;  %vm375_vm3 = vweird.f32 %v369_v30 }
  0xd7   : > { %v382_v38 = vor.u32 1.1754944e-38, %v381_v34  ;;  %vm380_vm5 = vcmp.eq.f32.partialorder %v379_v36, 8.507059e+37 }
  0xdb   : > { %v663_v31 = vpop.eup %662 }
  0xdc   : > { %v371_v32 = vmul.f32 %v663_v31, %v369_v30  ;;  %vm376_vm2 = vweird.f32 %v663_v31 }
  0xdd   : > { %vm377_vm4 = vmor %vm375_vm3, %vm376_vm2 }
  0xde   : > { %v372_v33 = vsub.f32 1.0, %v371_v32 }
  0xe0   : > { %v373_v35 = vmul.f32 %v663_v31, %v372_v33 }
  0xe2   : > { %v374_v37 = vadd.f32 %v663_v31, %v373_v35 }
  0xe4   : > { %v378_v39 = vsel %vm377_vm4, %v663_v31, %v374_v37 }
  0xe5   : > { %v383_v40 = vsel %vm380_vm5, %v382_v38, %v378_v39 }
  0xe6   : > { %389 = vperm.xlu0 %657, %v383_v40  }
 0x158   : > { %v390_v42 = vpop.permute.xlu0 %389 }
 0x159   : > { %v391_v43 = vmul.f32 %v390_v42, %v384_v41 }
 0x15b   : > { %411 = vmatpush.msra.mxu1 %v391_v43 }
 0x15c   : > { %582 = vmatmul.msk.f32.vlgmr.msra.gmra.mxu1 %vm352_vm1, %v661_v23 }
 0x1d9   : > { %v413_v45 = vpop.f32.mrf.mxu1 }
 0x1da   : > { %v416_v46 = vadd.f32 %v413_v45, %v392_v44 }
 0x1dc   : > { %417 = vst.msk [vmem:[#allocation2] sm:$0xff] %vm310_vm0, %v416_v46 }
 0x1e3   : > { %v421_v47 = vld [vmem:[#allocation2] sm:$0xff] }
 0x1e4   : > { %422 = vst.msk [vmem:[%s297_s12] sm:$0xff] %vm310_vm0, %v421_v47 }
 0x1e5   : > { %751 = shalt.err (!%p748_p0)
}
 0x1e6   : > { %591 = dma.vmem_to_hbm [thread:$0]  (%p890_p9), %s437_s23, 128, %s439_s5, %s424_s6  }
 0x1e7 PF: > { %s450_s25 = sand.u32 1, %s790_s15   ;;  %p601_p1 = pnand %p569_p12, %p897_p11 }
 0x1e8   : > { %s451_s24 = scalar_lea.sflag [#allocation5], %s450_s25 }
 0x1e9   : > { %p602_p2 = pneg %p601_p1 }
 0x1eb   : > { %785 = dma.done.wait (%p602_p2), %s451_s24, 128  }
 0x1ec   : > { %787 = vsyncadd (%p602_p2), %s451_s24, 4294967168  ;;  %s23_s20 = sadd.s32 1, %s810_s20   ;;  %s1001_s28 = sld [smem:[#allocation12_spill]] }
 0x1ed   : > { %p20_p3 = scmp.ge.s32.totalorder %s23_s20, 4   ;;  %s1002_s15 = smov %s794_s16 }
 0x1ee   : > { %s1003_s16 = smov %s798_s17  ;;  %s1004_s17 = smov %s895_s29 }
 0x1ef   : > { %s1005_s18 = smov %s806_s19  ;;  %22 = sbr.rel (!%p20_p3) target bundleno = 8 (0x8), region = 108 }
 0x1f2   : > { %s1006_s19 = smov %s1001_s28 }
 0x1f4   :  { %457 = vsyncpa [#allocation4], 1 }
 0x1f5   :  { %459 = vsyncpa [#allocation4 + $0x1], 1 }
 0x1f6   :  { %460 = vsyncpa [#allocation7], 1 }
 0x1f7   :  { %462 = vsyncpa [#allocation7 + $0x1], 1 }
 0x1f8   :  { %463 = vsyncpa [#allocation5], 1 }
 0x1f9   :  { %465 = vsyncpa [#allocation5 + $0x1], 1 }

</bundles_post_ra>
